<compile_context>
chip_gen: v7x
topology: tpu7x:2x2x1
jax: 0.10.0
libtpu: 0.0.40
codegen_flags: <defaults>
</compile_context>

<pallas_src>
import jax
import jax.numpy as jnp
from jax.experimental import pallas as pl
from jax.experimental.pallas import tpu as pltpu


def _round_up(x, m):
    return ((x + m - 1) // m) * m


def _rul_mlp_kernel(x_ref, wp_ref, b12_ref, b3_ref, o_ref):
    # wp_ref packs [w1 (E,H); w2 (H,H); w3_row (1,H)] along axis 0, in the
    # compute dtype.  Static shapes let us recover E/H here.
    H = wp_ref.shape[1]
    E = wp_ref.shape[0] - H - 1
    cdt = wp_ref.dtype

    x = x_ref[...].astype(cdt)                 # in-kernel operand cast (no HBM pass)
    w1 = wp_ref[0:E, :]
    w2 = wp_ref[E:E + H, :]
    w3r = wp_ref[E + H:E + H + 1, :]

    # Layer 1: Linear(E -> H) + ReLU.  MXU matmul, f32 accumulation.
    h1 = jnp.dot(x, w1, preferred_element_type=jnp.float32)
    h1 = jnp.maximum(h1 + b12_ref[0:1, :], 0.0)        # f32 VPU ops (v5e-safe)

    # Dropout(p) -> identity in eval mode.

    # Layer 2: Linear(H -> H) + ReLU.
    h2 = jnp.dot(h1.astype(cdt), w2, preferred_element_type=jnp.float32)
    h2 = jnp.maximum(h2 + b12_ref[1:2, :], 0.0)

    # Layer 3: Linear(H -> 1), computed as (1,H) x (bb,H)^T -> (1,bb) so the
    # output block is lane-dense (full-width stores, no masked vst).
    out_row = jax.lax.dot_general(
        w3r, h2.astype(cdt),
        dimension_numbers=(((1,), (1,)), ((), ())),
        preferred_element_type=jnp.float32)
    o_ref[...] = (out_row + b3_ref[0, 0]).astype(o_ref.dtype)


def rul_estimator_forward(z, params, *, block_b=4096, compute_dtype=jnp.float32):
    """z: (B, embed_dim) -> (B, 1) float32.

    Weights are stored transposed vs. torch, i.e. (in, out).  compute_dtype
    controls the matmul-operand dtype (f32 or bf16); accumulation, bias-add and
    ReLU are always f32.  z is passed through in its own dtype (pass bf16 z to
    halve HBM traffic); the operand cast happens inside the kernel.
    """
    w1, b1, w2, b2, w3, b3 = params
    B, E = z.shape
    H = w1.shape[1]
    cdt = jnp.dtype(compute_dtype)

    # --- batch tiling -------------------------------------------------------
    # Hard cap keeps x tile + f32 intermediates a few MiB, far under scoped
    # VMEM on every generation (incl. v7x's 64 MiB physical / 32 MiB scoped).
    MAX_BB = 8192
    eff_block = min(int(block_b), MAX_BB)
    if B <= eff_block:
        # Single step: block equals the full array dims, so the (8,128)
        # BlockSpec constraint is satisfied with no padding and no masking.
        bb = B
    else:
        bb = _round_up(eff_block, 128)
        # Keep >= 4 blocks so the "parallel" axis can use both v7x TensorCores.
        bb = min(bb, max(128, _round_up(pl.cdiv(B, 4), 128)))
    grid = (pl.cdiv(B, bb),)   # ragged last block handled by Pallas masking

    # --- pack resident parameters (tiny, one-time) --------------------------
    wpack = jnp.concatenate(
        [w1.astype(cdt), w2.astype(cdt), w3.reshape(1, H).astype(cdt)], axis=0)
    b12 = jnp.concatenate([b1, b2], axis=0).astype(jnp.float32)   # (2, H) f32
    b3s = jnp.reshape(b3, (1, 1)).astype(jnp.float32)             # SMEM scalar

    out_row = pl.pallas_call(
        _rul_mlp_kernel,
        out_shape=jax.ShapeDtypeStruct((1, B), jnp.float32),
        grid_spec=pltpu.PrefetchScalarGridSpec(
            num_scalar_prefetch=0,
            grid=grid,
            in_specs=[
                pl.BlockSpec((bb, E), lambda i: (i, 0)),            # x tile
                pl.BlockSpec((E + H + 1, H), lambda i: (0, 0)),     # packed w1|w2|w3
                pl.BlockSpec((2, H), lambda i: (0, 0)),             # packed b1|b2
                pl.BlockSpec(memory_space=pltpu.MemorySpace.SMEM),  # b3 scalar
            ],
            out_specs=pl.BlockSpec((1, bb), lambda i: (0, i)),      # lane-dense row
        ),
        compiler_params=pltpu.CompilerParams(
            dimension_semantics=("parallel",)),
    )(z, wpack, b12, b3s)

    # (1, B) -> (B, 1) is a metadata-only row-major reshape.
    return out_row.reshape(B, 1)


def init_params(key, embed_dim, hidden_dim):
    """Deterministic init mirroring torch.nn.Linear (uniform +-1/sqrt(fan_in)).
    Weights are stored as (in, out) = torch weight transposed."""
    k1, k2, k3, k4, k5, k6 = jax.random.split(key, 6)

    def lin(kw, kb, fan_in, fan_out):
        bound = 1.0 / jnp.sqrt(fan_in)
        w = jax.random.uniform(kw, (fan_in, fan_out), jnp.float32, -bound, bound)
        b = jax.random.uniform(kb, (1, fan_out), jnp.float32, -bound, bound)
        return w, b

    w1, b1 = lin(k1, k2, embed_dim, hidden_dim)
    w2, b2 = lin(k3, k4, hidden_dim, hidden_dim)
    w3, b3 = lin(k5, k6, hidden_dim, 1)
    return (w1, b1, w2, b2, w3, b3)


def rul_estimator_ref(z, params, compute_dtype=jnp.float32):
    """Pure-JAX reference mirroring the kernel's casting scheme exactly."""
    w1, b1, w2, b2, w3, b3 = params
    cdt = jnp.dtype(compute_dtype)
    h = jnp.dot(z.astype(cdt), w1.astype(cdt), preferred_element_type=jnp.float32)
    h = jnp.maximum(h + b1, 0.0)
    h = jnp.dot(h.astype(cdt), w2.astype(cdt), preferred_element_type=jnp.float32)
    h = jnp.maximum(h + b2, 0.0)
    out = jnp.dot(h.astype(cdt), w3.astype(cdt), preferred_element_type=jnp.float32)
    return out + b3


if __name__ == "__main__":
    embed_dim = 32
    hidden_dim = 32

    key = jax.random.PRNGKey(0)
    kz, kp, kz2 = jax.random.split(key, 3)
    params = init_params(kp, embed_dim, hidden_dim)

    # 1) Small batch, f32, single grid step (block equals full array dims).
    z_small = jax.random.normal(kz, (8, embed_dim), dtype=jnp.float32)
    pred = jax.block_until_ready(rul_estimator_forward(z_small, params))
    ref = rul_estimator_ref(z_small, params)
    assert pred.shape == (8, 1), pred.shape
    assert jnp.allclose(pred, ref, atol=1e-5, rtol=1e-5), "f32 small-batch mismatch"

    # 2) Ragged batch, f32, multi-step grid with a masked partial last block
    #    (no wrapper jnp.pad): 1000 rows, bb=256 -> 4 blocks, last block ragged.
    z_big = jax.random.normal(kz2, (1000, embed_dim), dtype=jnp.float32)
    pred_big = jax.block_until_ready(
        rul_estimator_forward(z_big, params, block_b=256))
    ref_big = rul_estimator_ref(z_big, params)
    assert pred_big.shape == (1000, 1), pred_big.shape
    assert jnp.allclose(pred_big, ref_big, atol=1e-5, rtol=1e-5), "f32 big-batch mismatch"

    # 3) bf16 matmul operands (f32 accumulation / bias / ReLU), bf16 z supplied
    #    by the producer so the only large HBM stream is already half-width.
    z_bf16 = z_big.astype(jnp.bfloat16)
    pred_bf16 = jax.block_until_ready(
        rul_estimator_forward(z_bf16, params, block_b=256,
                              compute_dtype=jnp.bfloat16))
    ref_bf16 = rul_estimator_ref(z_bf16, params, compute_dtype=jnp.bfloat16)
    assert pred_bf16.shape == (1000, 1), pred_bf16.shape
    assert jnp.allclose(pred_bf16, ref_bf16, atol=1e-2, rtol=1e-2), "bf16 mismatch"

    print("KERNEL_OK")
</pallas_src>

<mosaic_0001>
module attributes {stable_mosaic.version = 11 : i64} {
  func.func @_rul_mlp_kernel(%arg0: i32, %arg1: memref<8x32xf32, #tpu.memory_space<vmem>>, %arg2: memref<65x32xf32, #tpu.memory_space<vmem>>, %arg3: memref<2x32xf32, #tpu.memory_space<vmem>>, %arg4: memref<1x1xf32, #tpu.memory_space<smem>>, %arg5: memref<1x8xf32, #tpu.memory_space<vmem>>) attributes {dimension_semantics = [#tpu.dimension_semantics<parallel>], iteration_bounds = array<i64: 1>, scalar_prefetch = 0 : i64, scratch_operands = 0 : i64, tpu.core_type = #tpu.core_type<tc>, window_params = [{transform_indices = @transform_0, window_bounds = array<i64: 8, 32>}, {pipeline_mode = #tpu.pipeline_mode<synchronous>, transform_indices = @transform_1, window_bounds = array<i64: 65, 32>}, {pipeline_mode = #tpu.pipeline_mode<synchronous>, transform_indices = @transform_2, window_bounds = array<i64: 2, 32>}, {transform_indices = @transform_3, window_bounds = array<i64: 1, 1>}, {transform_indices = @transform_4, window_bounds = array<i64: 1, 8>}]} {
    %c0 = arith.constant 0 : index
    %c0_0 = arith.constant 0 : index
    %0 = vector.load %arg1[%c0, %c0_0] : memref<8x32xf32, #tpu.memory_space<vmem>>, vector<8x32xf32>
    %c0_1 = arith.constant 0 : index
    %c0_2 = arith.constant 0 : index
    %1 = vector.load %arg2[%c0_1, %c0_2] : memref<65x32xf32, #tpu.memory_space<vmem>>, vector<32x32xf32>
    %c32 = arith.constant 32 : index
    %c0_3 = arith.constant 0 : index
    %2 = vector.load %arg2[%c32, %c0_3] : memref<65x32xf32, #tpu.memory_space<vmem>>, vector<32x32xf32>
    %c64 = arith.constant 64 : index
    %c0_4 = arith.constant 0 : index
    %3 = vector.load %arg2[%c64, %c0_4] : memref<65x32xf32, #tpu.memory_space<vmem>>, vector<1x32xf32>
    %cst = arith.constant dense<0.000000e+00> : vector<8x32xf32>
    %4 = tpu.matmul %0, %1, %cst {dimension_numbers = #tpu.dot_dimension_numbers<[1], [0], [0], [1], [0, 0, 1, 1], [], []>} : vector<8x32xf32>, vector<32x32xf32>, vector<8x32xf32> -> vector<8x32xf32>
    %c0_5 = arith.constant 0 : index
    %c0_6 = arith.constant 0 : index
    %5 = vector.load %arg3[%c0_5, %c0_6] : memref<2x32xf32, #tpu.memory_space<vmem>>, vector<1x32xf32>
    %6 = vector.broadcast %5 : vector<1x32xf32> to vector<8x32xf32>
    %7 = arith.addf %4, %6 : vector<8x32xf32>
    %cst_7 = arith.constant 0.000000e+00 : f32
    %8 = vector.broadcast %cst_7 : f32 to vector<8x32xf32>
    %9 = arith.maximumf %7, %8 : vector<8x32xf32>
    %cst_8 = arith.constant dense<0.000000e+00> : vector<8x32xf32>
    %10 = tpu.matmul %9, %2, %cst_8 {dimension_numbers = #tpu.dot_dimension_numbers<[1], [0], [0], [1], [0, 0, 1, 1], [], []>} : vector<8x32xf32>, vector<32x32xf32>, vector<8x32xf32> -> vector<8x32xf32>
    %c1 = arith.constant 1 : index
    %c0_9 = arith.constant 0 : index
    %11 = vector.load %arg3[%c1, %c0_9] : memref<2x32xf32, #tpu.memory_space<vmem>>, vector<1x32xf32>
    %12 = vector.broadcast %11 : vector<1x32xf32> to vector<8x32xf32>
    %13 = arith.addf %10, %12 : vector<8x32xf32>
    %cst_10 = arith.constant 0.000000e+00 : f32
    %14 = vector.broadcast %cst_10 : f32 to vector<8x32xf32>
    %15 = arith.maximumf %13, %14 : vector<8x32xf32>
    %cst_11 = arith.constant dense<0.000000e+00> : vector<1x8xf32>
    %16 = tpu.matmul %3, %15, %cst_11 {dimension_numbers = #tpu.dot_dimension_numbers<[1], [1], [0], [0], [0, 0, 1, 0], [], []>} : vector<1x32xf32>, vector<8x32xf32>, vector<1x8xf32> -> vector<1x8xf32>
    %c0_12 = arith.constant 0 : index
    %c0_13 = arith.constant 0 : index
    %17 = memref.load %arg4[%c0_12, %c0_13] : memref<1x1xf32, #tpu.memory_space<smem>>
    %18 = vector.broadcast %17 : f32 to vector<1x8xf32>
    %19 = arith.addf %16, %18 : vector<1x8xf32>
    %c0_14 = arith.constant 0 : index
    %c0_15 = arith.constant 0 : index
    %20 = vector.load %arg5[%c0_14, %c0_15] : memref<1x8xf32, #tpu.memory_space<vmem>>, vector<1x8xf32>
    tpu.vector_store %arg5[%c0_14, %c0_15], %19 {strides = array<i32>} : memref<1x8xf32, #tpu.memory_space<vmem>>, vector<1x8xf32>,
    return
  }
  func.func @transform_0(%arg0: i32) -> (i32, i32) {
    %c0_i32 = arith.constant 0 : i32
    %c0_i32_0 = arith.constant 0 : i32
    return %arg0, %c0_i32 : i32, i32
  }
  func.func @transform_1(%arg0: i32) -> (i32, i32) {
    %c0_i32 = arith.constant 0 : i32
    %c0_i32_0 = arith.constant 0 : i32
    %c0_i32_1 = arith.constant 0 : i32
    return %c0_i32, %c0_i32_0 : i32, i32
  }
  func.func @transform_2(%arg0: i32) -> (i32, i32) {
    %c0_i32 = arith.constant 0 : i32
    %c0_i32_0 = arith.constant 0 : i32
    %c0_i32_1 = arith.constant 0 : i32
    return %c0_i32, %c0_i32_0 : i32, i32
  }
  func.func @transform_3(%arg0: i32) -> (i32, i32) {
    %c0_i32 = arith.constant 0 : i32
    %c0_i32_0 = arith.constant 0 : i32
    %c0_i32_1 = arith.constant 0 : i32
    return %c0_i32, %c0_i32_0 : i32, i32
  }
  func.func @transform_4(%arg0: i32) -> (i32, i32) {
    %c0_i32 = arith.constant 0 : i32
    %c0_i32_0 = arith.constant 0 : i32
    return %c0_i32, %arg0 : i32, i32
  }
}

</mosaic_0001>

<bundles_post_ra>
// kernel: tpu_custom_call.1
= control target key start
LH: loop header
LB: loop body
LE: loop exit
PB: predicated region body
PF: predicated region fallthrough
CT: control target
= control target key end

     0   :  { %v367_v3 = vmov 0.0|0.0   ;;  %vm368_vm0 = vmmov 0   ;;  %v369_v6 = vmov 0.0   ;;  %s454_s0 = inlined_call_operand.vmem [shape: f32[8,32], index: 0, kind: input, shape index: {}]   ;;  %s455_s1 = inlined_call_operand.vmem [shape: f32[65,32], index: 1, kind: input, shape index: {}]   ;;  %s456_s2 = inlined_call_operand.vmem [shape: f32[2,32], index: 2, kind: input, shape index: {}]   ;;  %s457_s3 = inlined_call_operand.<no memory space> [shape: f32[1,1], index: 3, kind: input, shape index: {}]   ;;  %s458_s4 = inlined_call_operand.hbm [shape: f32[1,8], index: 4, kind: output, shape index: {}]  }
   0x1   :  { %v20_v0 = vld [vmem:[%s455_s1] sm:$0xff]  ;;  %v21_v1 = vld [vmem:[%s455_s1 + $0x8] sm:$0xff]  ;;  %v22_v2 = vld [vmem:[%s455_s1 + $0x10] sm:$0xff]  ;;  %327 = vmatprep.subr.bf16.mxu0 %v367_v3  ;;  %308 = vmatprep.mubr.msk.f32.mxu0 %vm368_vm0, %v369_v6 }
   0x2   :  { %v328_v4 = vpack.c.bf16 %v21_v1, %v20_v0  ;;  %v23_v5 = vld [vmem:[%s455_s1 + $0x18] sm:$0xff]  ;;  %v24_v7 = vld [vmem:[%s455_s1 + $0x20] sm:$0xff]  ;;  %333 = vmatprep.subr.bf16.mxu1 %v367_v3  ;;  %v25_v8 = vld [vmem:[%s455_s1 + $0x28] sm:$0xff]  ;;  %319 = vmatprep.mubr.msk.f32.mxu1 %vm368_vm0, %v369_v6 }
   0x3   :  { %10 = vsyncpa [#allocation4], 0  ;;  %v331_v9 = vpack.c.bf16 %v23_v5, %v22_v2  ;;  %v334_v10 = vpack.c.bf16 %v25_v8, %v24_v7  ;;  %v19_v11 = vld [vmem:[%s454_s0] sm:$0xff]  ;;  %vm34_vm1 = vcmask 261120   ;;  %v26_v12 = vld [vmem:[%s455_s1 + $0x30] sm:$0xff]  ;;  %v189_v26 = vstv %s457_s3  ;;  %s370_s14 = smov [#allocation3]  }
   0x4   :  { %329 = vmatpush3.bf16.msra.mxu0 %v328_v4  ;;  %v27_v13 = vld [vmem:[%s455_s1 + $0x38] sm:$0xff]  ;;  %v282_v15 = vld [vmem:[%s456_s2] ss:$0 sm:$0xff]  ;;  %v284_v20 = vld [vmem:[%s456_s2 + $0x1] ss:$0 sm:$0xff]  ;;  %s274_s15 = sshll.u32 %s370_s14, 4  ;;  %s275_s15 = int_to_ptr.vmem [resolvable:$true] %s274_s15 }
   0x5   :  { %330 = vmatprep.subr.bf16.mxu0 %v367_v3  ;;  %335 = vmatpush3.bf16.msra.mxu1 %v334_v10  ;;  %v337_v14 = vpack.c.bf16 %v27_v13, %v26_v12  ;;  %v28_v25 = vld [vmem:[%s455_s1 + $0x40] sm:$0x1]  ;;  %vm266_vm2 = vcmask 57344   ;;  %s343_s2 = scalar_lea.vmem %s275_s15, 16  ;;  %s347_s16 = scalar_lea.vmem %s275_s15, 32 }
   0x6   :  { %336 = vmatprep.subr.bf16.mxu1 %v367_v3  ;;  %p344_p0 = scmp.ne.s32.totalorder %s275_s15, %s343_s2  ;;  %p348_p1 = scmp.lt.s32.totalorder %s275_s15, %s275_s15 }
   0x7   :  { %p349_p2 = scmp.lt.s32.totalorder %s347_s16, %s343_s2 }
   0x8   :  { %332 = vmatpush3.bf16.msra.mxu0 %v331_v9 }
   0x9   :  { %322 = vmatprep.subr.mxu0 %v369_v6  ;;  %338 = vmatpush3.bf16.msra.mxu1 %v337_v14  ;;  %p350_p3 = por %p349_p2, %p348_p1 }
   0xb   :  { %309 = vmatmul.mubr.msk.f32.vlgmr.msra.gmra.mrb[0].mxu0 %vm34_vm1, %v19_v11  ;;  %p351_p4 = pnand %p350_p3, %p344_p0 }
   0xc   :  { %324 = vmatprep.mubr.msk.f32.mxu0 %vm368_vm0, %v369_v6 }
  0xde   :  { %v104_v16 = vpop.f32.mrb[0].mxu0 }
  0xdf   :  { %v105_v17 = vadd.f32 %v282_v15, %v104_v16  ;;  %v310_v18 = vpop.f32.mrb[1].mxu0 }
  0xe1   :  { %v108_v19 = vmax.f32 %v105_v17, 0.0 }
  0xe3   :  { %320 = vmatmul.mubr.msk.f32.vlgmr.msra.gmra.mrb[0].mxu1 %vm34_vm1, %v108_v19 }
 0x1b6   :  { %v183_v21 = vpop.f32.mrb[0].mxu1 }
 0x1b7   :  { %v184_v22 = vadd.f32 %v284_v20, %v183_v21  ;;  %v321_v23 = vpop.f32.mrb[1].mxu1 }
 0x1b9   :  { %v187_v24 = vmax.f32 %v184_v22, 0.0 }
 0x1bb   :  { %323 = vmatpush3.xpose.msk.msra.mxu0 %vm34_vm1, %v187_v24 }
 0x1be   :  { %325 = vmatmul.mubr.msk.f32.vlgmr.msra.gmra.mrb[2].mxu0 %vm34_vm1, %v28_v25 }
 0x291   :  { %v262_v27 = vpop.f32.mrb[2].mxu0 }
 0x292   :  { %v263_v28 = vadd.f32 %v262_v27, %v189_v26  ;;  %v326_v29 = vpop.f32.mrb[3].mxu0 }
 0x294   :  { %267 = vst.msk [vmem:[#allocation3] sm:$0x1] %vm266_vm2, %v263_v28 }
 0x295   :  { %354 = shalt.err (!%p351_p4)
}
 0x296   :  { %s355_s3 = scalar_lea.hbm %s458_s4, 16 }
 0x297   :  { %p356_p5 = scmp.ne.s32.totalorder %s458_s4, %s355_s3  ;;  %p359_p6 = scmp.lt.u32.totalorder %s355_s3, %s458_s4 }
 0x299   :  { %p361_p7 = pnand %p359_p6, %p356_p5 }
 0x29b   :  { %364 = shalt.err (!%p361_p7)
}
 0x29c   :  { %277 = dma.vmem_to_hbm [thread:$0]  %s275_s15, 16, %s458_s4, [#allocation4]  }
 0x29d   :  { %365 = dma.done.wait [#allocation4], 16  }
 0x29e   :  { %366 = vsyncadd [#allocation4], 4294967280 }
 0x29f   :  { %281 = vsyncpa [#allocation4], 1 }

</bundles_post_ra>
